<compile_context>
chip_gen: v7x
topology: tpu7x:2x2x1
jax: 0.10.0
libtpu: 0.0.40
codegen_flags: <defaults>
</compile_context>

<pallas_src>
import jax
import jax.numpy as jnp
from jax.experimental import pallas as pl
from jax.experimental.pallas import tpu as pltpu

IN_FEATURES = 28 * 28      # 784
HIDDEN = 256
OUT_FEATURES = 10
OUT_PADDED = 128           # lane-dense output width
NEG_BIG = -1e30            # softmax-neutral bias for padded logit columns


def _round_up(x, m):
    return ((x + m - 1) // m) * m


def mlp_softmax_kernel(x_ref, w1_ref, b1_ref, w2_ref, b2_ref, out_ref):
    # x: (TM, 784) f32, w1: (784, 256) bf16, b1: (1, 256) f32,
    # w2: (256, 128) bf16, b2: (1, 128) f32, out: (TM, 128) bf16

    # In-kernel cast of the activation tile (VPU, hidden under the input DMA).
    x = x_ref[...].astype(jnp.bfloat16)

    # Linear(784 -> 256) + ReLU  (bf16 MXU matmul, f32 accumulation)
    h = jnp.dot(x, w1_ref[...], preferred_element_type=jnp.float32) + b1_ref[...]
    h = jnp.maximum(h, 0.0)

    # Linear(256 -> 10), padded to 128 output lanes (pad cols: w2=0, b2=-1e30)
    logits = jnp.dot(h.astype(jnp.bfloat16), w2_ref[...],
                     preferred_element_type=jnp.float32) + b2_ref[...]

    # Numerically stable softmax over the 128 lanes; padded columns contribute
    # exp(-1e30 - m) == 0, so the first 10 lanes match torch.nn.Softmax(dim=1).
    m = jnp.max(logits, axis=1, keepdims=True)
    e = jnp.exp(logits - m)
    denom = jnp.sum(e, axis=1, keepdims=True)
    out_ref[...] = (e / denom).astype(out_ref.dtype)   # exact divide; cast to bf16 on store


def cnnetwork_forward(x_nchw, w1, b1, w2, b2, tm=512):
    """x_nchw: (B, 1, 28, 28) float32 -> (B, 10) softmax probabilities (bf16)."""
    B = x_nchw.shape[0]

    # nn.Flatten(): flatten all dims after batch (row-major, same as torch).
    # This is a free contiguous view; no padding / casting of x in the wrapper.
    x2d = x_nchw.reshape(B, -1).astype(jnp.float32)
    assert x2d.shape[1] == IN_FEATURES

    # Batch tile: multiple of 8 sublanes, capped at `tm`, and <= ceil(B/2) so the
    # parallel grid has >= 2 steps whenever B allows it (v7x megacore sharding).
    TM = min(tm, max(8, _round_up(pl.cdiv(B, 2), 8)))
    grid = (pl.cdiv(B, TM),)

    # Weight padding / casts (tiny, one-time, done outside the kernel).
    w1p = w1.astype(jnp.bfloat16)                                  # (784, 256)
    b1p = b1.reshape(1, HIDDEN).astype(jnp.float32)                # (1, 256)
    w2p = jnp.pad(w2.astype(jnp.float32),
                  ((0, 0), (0, OUT_PADDED - OUT_FEATURES))).astype(jnp.bfloat16)
    b2p = jnp.pad(b2.reshape(1, OUT_FEATURES).astype(jnp.float32),
                  ((0, 0), (0, OUT_PADDED - OUT_FEATURES)),
                  constant_values=NEG_BIG)

    out = pl.pallas_call(
        mlp_softmax_kernel,
        out_shape=jax.ShapeDtypeStruct((B, OUT_PADDED), jnp.bfloat16),
        grid_spec=pltpu.PrefetchScalarGridSpec(
            num_scalar_prefetch=0,
            grid=grid,
            in_specs=[
                # x tile marches over the batch; weights/biases stay resident.
                pl.BlockSpec((TM, IN_FEATURES), lambda i: (i, 0)),
                pl.BlockSpec((IN_FEATURES, HIDDEN), lambda i: (0, 0)),
                pl.BlockSpec((1, HIDDEN), lambda i: (0, 0)),
                pl.BlockSpec((HIDDEN, OUT_PADDED), lambda i: (0, 0)),
                pl.BlockSpec((1, OUT_PADDED), lambda i: (0, 0)),
            ],
            out_specs=pl.BlockSpec((TM, OUT_PADDED), lambda i: (i, 0)),
        ),
        compiler_params=pltpu.CompilerParams(
            dimension_semantics=("parallel",),
        ),
    )(x2d, w1p, b1p, w2p, b2p)

    # Drop the 118 padded output lanes (no batch padding was ever materialized).
    return out[:B, :OUT_FEATURES]


def init_params(key):
    """Deterministic init mimicking nn.Linear's U(-1/sqrt(fan_in), 1/sqrt(fan_in))."""
    k1, k2, k3, k4 = jax.random.split(key, 4)
    bound1 = 1.0 / jnp.sqrt(jnp.float32(IN_FEATURES))
    bound2 = 1.0 / jnp.sqrt(jnp.float32(HIDDEN))
    # Stored as (in, out) so the kernel does x @ W (equivalent to torch's x @ W.T).
    w1 = jax.random.uniform(k1, (IN_FEATURES, HIDDEN), jnp.float32, -bound1, bound1)
    b1 = jax.random.uniform(k2, (1, HIDDEN), jnp.float32, -bound1, bound1)
    w2 = jax.random.uniform(k3, (HIDDEN, OUT_FEATURES), jnp.float32, -bound2, bound2)
    b2 = jax.random.uniform(k4, (1, OUT_FEATURES), jnp.float32, -bound2, bound2)
    return w1, b1, w2, b2


def _reference_forward(x_nchw, w1, b1, w2, b2):
    """Pure-JAX f32 reference matching the PyTorch module."""
    x = x_nchw.reshape(x_nchw.shape[0], -1)
    h = jnp.maximum(x @ w1 + b1, 0.0)
    logits = h @ w2 + b2
    return jax.nn.softmax(logits, axis=1)


if __name__ == "__main__":
    key = jax.random.PRNGKey(0)
    k_params, k_x = jax.random.split(key)

    w1, b1, w2, b2 = init_params(k_params)

    B = 2
    x = jax.random.normal(k_x, (B, 1, 28, 28), jnp.float32)  # NCHW, MNIST-shaped

    pred = cnnetwork_forward(x, w1, b1, w2, b2)
    pred = jax.block_until_ready(pred)

    # sanity: shape, softmax rows sum to ~1 (bf16 output quantization ~4e-3),
    # close to the f32 reference (bf16 MXU matmuls + bf16 store).
    assert pred.shape == (B, OUT_FEATURES)
    pred_f32 = pred.astype(jnp.float32)
    assert jnp.allclose(jnp.sum(pred_f32, axis=1), 1.0, atol=1e-2)
    ref = _reference_forward(x, w1, b1, w2, b2)
    assert jnp.allclose(pred_f32, ref, atol=5e-2), float(jnp.max(jnp.abs(pred_f32 - ref)))

    print("KERNEL_OK")
</pallas_src>

<mosaic_0001>
module attributes {stable_mosaic.version = 11 : i64} {
  func.func @mlp_softmax_kernel(%arg0: i32, %arg1: memref<8x784xf32, #tpu.memory_space<vmem>>, %arg2: memref<784x256xbf16, #tpu.memory_space<vmem>>, %arg3: memref<1x256xf32, #tpu.memory_space<vmem>>, %arg4: memref<256x128xbf16, #tpu.memory_space<vmem>>, %arg5: memref<1x128xf32, #tpu.memory_space<vmem>>, %arg6: memref<8x128xbf16, #tpu.memory_space<vmem>>) attributes {dimension_semantics = [#tpu.dimension_semantics<parallel>], iteration_bounds = array<i64: 1>, scalar_prefetch = 0 : i64, scratch_operands = 0 : i64, tpu.core_type = #tpu.core_type<tc>, window_params = [{transform_indices = @transform_0, window_bounds = array<i64: 8, 784>}, {pipeline_mode = #tpu.pipeline_mode<synchronous>, transform_indices = @transform_1, window_bounds = array<i64: 784, 256>}, {pipeline_mode = #tpu.pipeline_mode<synchronous>, transform_indices = @transform_2, window_bounds = array<i64: 1, 256>}, {pipeline_mode = #tpu.pipeline_mode<synchronous>, transform_indices = @transform_3, window_bounds = array<i64: 256, 128>}, {pipeline_mode = #tpu.pipeline_mode<synchronous>, transform_indices = @transform_4, window_bounds = array<i64: 1, 128>}, {transform_indices = @transform_5, window_bounds = array<i64: 8, 128>}]} {
    %c0 = arith.constant 0 : index
    %c0_0 = arith.constant 0 : index
    %0 = vector.load %arg1[%c0, %c0_0] : memref<8x784xf32, #tpu.memory_space<vmem>>, vector<8x784xf32>
    %1 = arith.truncf %0 : vector<8x784xf32> to vector<8x784xbf16>
    %c0_1 = arith.constant 0 : index
    %c0_2 = arith.constant 0 : index
    %2 = vector.load %arg2[%c0_1, %c0_2] : memref<784x256xbf16, #tpu.memory_space<vmem>>, vector<784x256xbf16>
    %cst = arith.constant dense<0.000000e+00> : vector<8x256xf32>
    %3 = tpu.matmul %1, %2, %cst {dimension_numbers = #tpu.dot_dimension_numbers<[1], [0], [0], [1], [0, 0, 1, 1], [], []>} : vector<8x784xbf16>, vector<784x256xbf16>, vector<8x256xf32> -> vector<8x256xf32>
    %c0_3 = arith.constant 0 : index
    %c0_4 = arith.constant 0 : index
    %4 = vector.load %arg3[%c0_3, %c0_4] : memref<1x256xf32, #tpu.memory_space<vmem>>, vector<1x256xf32>
    %5 = vector.broadcast %4 : vector<1x256xf32> to vector<8x256xf32>
    %6 = arith.addf %3, %5 : vector<8x256xf32>
    %cst_5 = arith.constant 0.000000e+00 : f32
    %7 = vector.broadcast %cst_5 : f32 to vector<8x256xf32>
    %8 = arith.maximumf %6, %7 : vector<8x256xf32>
    %9 = arith.truncf %8 : vector<8x256xf32> to vector<8x256xbf16>
    %c0_6 = arith.constant 0 : index
    %c0_7 = arith.constant 0 : index
    %10 = vector.load %arg4[%c0_6, %c0_7] : memref<256x128xbf16, #tpu.memory_space<vmem>>, vector<256x128xbf16>
    %cst_8 = arith.constant dense<0.000000e+00> : vector<8x128xf32>
    %11 = tpu.matmul %9, %10, %cst_8 {dimension_numbers = #tpu.dot_dimension_numbers<[1], [0], [0], [1], [0, 0, 1, 1], [], []>} : vector<8x256xbf16>, vector<256x128xbf16>, vector<8x128xf32> -> vector<8x128xf32>
    %c0_9 = arith.constant 0 : index
    %c0_10 = arith.constant 0 : index
    %12 = vector.load %arg5[%c0_9, %c0_10] : memref<1x128xf32, #tpu.memory_space<vmem>>, vector<1x128xf32>
    %13 = vector.broadcast %12 : vector<1x128xf32> to vector<8x128xf32>
    %14 = arith.addf %11, %13 : vector<8x128xf32>
    %cst_11 = arith.constant dense<0xFF800000> : vector<8xf32>
    %15 = vector.multi_reduction <maximumf>, %14, %cst_11 [1] : vector<8x128xf32> to vector<8xf32>
    %16 = vector.shape_cast %15 : vector<8xf32> to vector<8x1xf32>
    %17 = vector.broadcast %16 : vector<8x1xf32> to vector<8x128xf32>
    %18 = arith.subf %14, %17 : vector<8x128xf32>
    %19 = math.exp %18 : vector<8x128xf32>
    %cst_12 = arith.constant dense<0.000000e+00> : vector<8xf32>
    %20 = vector.multi_reduction <add>, %19, %cst_12 [1] : vector<8x128xf32> to vector<8xf32>
    %21 = vector.shape_cast %20 : vector<8xf32> to vector<8x1xf32>
    %22 = vector.broadcast %21 : vector<8x1xf32> to vector<8x128xf32>
    %23 = arith.divf %19, %22 : vector<8x128xf32>
    %24 = arith.truncf %23 : vector<8x128xf32> to vector<8x128xbf16>
    %c0_13 = arith.constant 0 : index
    %c0_14 = arith.constant 0 : index
    %25 = vector.load %arg6[%c0_13, %c0_14] : memref<8x128xbf16, #tpu.memory_space<vmem>>, vector<8x128xbf16>
    tpu.vector_store %arg6[%c0_13, %c0_14], %24 {strides = array<i32>} : memref<8x128xbf16, #tpu.memory_space<vmem>>, vector<8x128xbf16>,
    return
  }
  func.func @transform_0(%arg0: i32) -> (i32, i32) {
    %c0_i32 = arith.constant 0 : i32
    %c0_i32_0 = arith.constant 0 : i32
    return %arg0, %c0_i32 : i32, i32
  }
  func.func @transform_1(%arg0: i32) -> (i32, i32) {
    %c0_i32 = arith.constant 0 : i32
    %c0_i32_0 = arith.constant 0 : i32
    %c0_i32_1 = arith.constant 0 : i32
    return %c0_i32, %c0_i32_0 : i32, i32
  }
  func.func @transform_2(%arg0: i32) -> (i32, i32) {
    %c0_i32 = arith.constant 0 : i32
    %c0_i32_0 = arith.constant 0 : i32
    %c0_i32_1 = arith.constant 0 : i32
    return %c0_i32, %c0_i32_0 : i32, i32
  }
  func.func @transform_3(%arg0: i32) -> (i32, i32) {
    %c0_i32 = arith.constant 0 : i32
    %c0_i32_0 = arith.constant 0 : i32
    %c0_i32_1 = arith.constant 0 : i32
    return %c0_i32, %c0_i32_0 : i32, i32
  }
  func.func @transform_4(%arg0: i32) -> (i32, i32) {
    %c0_i32 = arith.constant 0 : i32
    %c0_i32_0 = arith.constant 0 : i32
    %c0_i32_1 = arith.constant 0 : i32
    return %c0_i32, %c0_i32_0 : i32, i32
  }
  func.func @transform_5(%arg0: i32) -> (i32, i32) {
    %c0_i32 = arith.constant 0 : i32
    %c0_i32_0 = arith.constant 0 : i32
    return %arg0, %c0_i32 : i32, i32
  }
}

</mosaic_0001>

<bundles_post_ra>
// kernel: tpu_custom_call.1
= control target key start
LH: loop header
LB: loop body
LE: loop exit
PB: predicated region body
PF: predicated region fallthrough
CT: control target
= control target key end

     0   :  { %10 = vsyncpa [#allocation3], 0  ;;  %s1737_s0 = inlined_call_operand.hbm [shape: f32[2,784], index: 0, kind: input, shape index: {}]   ;;  %s1738_s1 = inlined_call_operand.hbm [shape: bf16[784,256], index: 1, kind: input, shape index: {}]   ;;  %s1739_s2 = inlined_call_operand.vmem [shape: f32[1,256], index: 2, kind: input, shape index: {}]   ;;  %s1740_s3 = inlined_call_operand.hbm [shape: bf16[256,128], index: 3, kind: input, shape index: {}]   ;;  %s1741_s4 = inlined_call_operand.vmem [shape: f32[1,128], index: 4, kind: input, shape index: {}]   ;;  %s1742_s5 = inlined_call_operand.hbm [shape: bf16[2,128], index: 5, kind: output, shape index: {}]  }
   0x1   :  { %11 = vsyncpa [#allocation6], 0 }
   0x2   :  { %12 = vsyncpa [#allocation4], 0 }
   0x3   :  { %17 = vsyncadd [#allocation3], 672  ;;  %s1610_s18 = smov [#allocation5]   ;;  %s1516_s22 = scalar_lea.hbm %s1738_s1, 12544 }
   0x4   :  { %s30_s19 = sshll.u32 %s1610_s18, 4  ;;  %p1517_p0 = scmp.ne.s32.totalorder %s1738_s1, %s1516_s22  ;;  %s31_s19 = int_to_ptr.vmem [resolvable:$true] %s30_s19 }
   0x5   :  { %p1520_p1 = scmp.lt.u32.totalorder %s1516_s22, %s1738_s1 }
   0x7   :  { %p1522_p2 = pnand %p1520_p1, %p1517_p0 }
   0x9   :  { %1525 = shalt.err (!%p1522_p2)
}
   0xa   :  { %s1526_s27 = scalar_lea.vmem %s31_s19, 12544  ;;  %p1531_p4 = scmp.lt.s32.totalorder %s31_s19, %s31_s19 }
   0xb   :  { %p1527_p3 = scmp.ne.s32.totalorder %s31_s19, %s1526_s27  ;;  %p1532_p5 = scmp.lt.s32.totalorder %s1526_s27, %s1526_s27 }
   0xd   :  { %p1533_p6 = por %p1532_p5, %p1531_p4 }
   0xf   :  { %p1534_p7 = pnand %p1533_p6, %p1527_p3 }
  0x11   :  { %1537 = shalt.err (!%p1534_p7)
}
  0x12   :  { %s1611_s28 = smov 128   ;;  %s1612_s29 = smov 8  }
  0x13   :  { %36 = dma.hbm_to_vmem [thread:$0]  %s1738_s1, 12544, %s31_s19, [#allocation6], %s1611_s28, %s1611_s28, %s1612_s29  }
  0x14   :  { %s1613_s7 = smov [#allocation2]   ;;  %s1538_s11 = scalar_lea.hbm %s1737_s0, 224 }
  0x15   :  { %s18_s8 = sshll.u32 %s1613_s7, 4  ;;  %p1539_p8 = scmp.ne.s32.totalorder %s1737_s0, %s1538_s11  ;;  %s19_s8 = int_to_ptr.vmem [resolvable:$true] %s18_s8 }
  0x16   :  { %p1542_p9 = scmp.lt.u32.totalorder %s1538_s11, %s1737_s0 }
  0x18   :  { %p1544_p10 = pnand %p1542_p9, %p1539_p8 }
  0x1a   :  { %1547 = shalt.err (!%p1544_p10)
}
  0x1b   :  { %s1548_s16 = scalar_lea.vmem %s19_s8, 224  ;;  %s1552_s1 = scalar_lea.vmem %s19_s8, 896 }
  0x1c   :  { %p1549_p11 = scmp.ne.s32.totalorder %s19_s8, %s1548_s16  ;;  %p1553_p12 = scmp.lt.s32.totalorder %s19_s8, %s19_s8 }
  0x1d   :  { %p1554_p13 = scmp.lt.s32.totalorder %s1552_s1, %s1548_s16 }
  0x1f   :  { %p1555_p0 = por %p1554_p13, %p1553_p12 }
  0x21   :  { %p1556_p1 = pnand %p1555_p0, %p1549_p11 }
  0x23   :  { %1559 = shalt.err (!%p1556_p1)
}
  0x24   :  { %s1614_s17 = smov 224   ;;  %s1615_s18 = smov 14  }
  0x25   :  { %24 = dma.hbm_to_vmem [thread:$0]  %s1737_s0, 224, %s19_s8, [#allocation3], %s1614_s17, %s1614_s17, %s1615_s18  }
  0x26   :  { %s1616_s21 = smov [#allocation7]   ;;  %s1560_s25 = scalar_lea.hbm %s1740_s3, 2048 }
  0x27   :  { %s44_s22 = sshll.u32 %s1616_s21, 4  ;;  %p1561_p2 = scmp.ne.s32.totalorder %s1740_s3, %s1560_s25  ;;  %s45_s22 = int_to_ptr.vmem [resolvable:$true] %s44_s22 }
  0x28   :  { %p1564_p3 = scmp.lt.u32.totalorder %s1560_s25, %s1740_s3 }
  0x2a   :  { %p1566_p4 = pnand %p1564_p3, %p1561_p2 }
  0x2c   :  { %1569 = shalt.err (!%p1566_p4)
}
  0x2d   :  { %s1570_s30 = scalar_lea.vmem %s45_s22, 2048  ;;  %p1575_p6 = scmp.lt.s32.totalorder %s45_s22, %s45_s22 }
  0x2e   :  { %p1571_p5 = scmp.ne.s32.totalorder %s45_s22, %s1570_s30  ;;  %p1576_p7 = scmp.lt.s32.totalorder %s1570_s30, %s1570_s30 }
  0x30   :  { %p1577_p8 = por %p1576_p7, %p1575_p6 }
  0x32   :  { %p1578_p9 = pnand %p1577_p8, %p1571_p5 }
  0x34   :  { %1581 = shalt.err (!%p1578_p9)
}
  0x35   :  { %s1617_s0 = smov 64   ;;  %s1618_s6 = smov 4  }
  0x36   :  { %50 = dma.hbm_to_vmem [thread:$0]  %s1740_s3, 2048, %s45_s22, [#allocation6], %s1617_s0, %s1617_s0, %s1618_s6  }
  0x37   :  { %1604 = dma.done.wait [#allocation3], 896  }
  0x38   :  { %1605 = vsyncadd [#allocation3], 4294966400 }
  0x39   :  { %1606 = dma.done.wait [#allocation6], 14592  }
  0x3a   :  { %1607 = vsyncadd [#allocation6], 4294952704  ;;  %v1337_v0 = vld [vmem:[#allocation5 + $0x104] ss:$8 sps:$4 sm:$0xff]   ;;  %v1339_v1 = vld [vmem:[#allocation5 + $0x100] ss:$8 sps:$4 sm:$0xff]   ;;  %v86_v13 = vlaneseq }
  0x3b   :  { %809 = vmatprep.subr.bf16.mxu0 %v1337_v0  ;;  %v1340_v2 = vld [vmem:[#allocation5 + $0x114] ss:$8 sps:$4 sm:$0xff]   ;;  %v1342_v3 = vld [vmem:[#allocation5 + $0x110] ss:$8 sps:$4 sm:$0xff]   ;;  %v1343_v4 = vld [vmem:[#allocation5 + $0x124] ss:$8 sps:$4 sm:$0xff]  }
  0x3c   :  { %810 = vmatpush1.bf16.msra.mxu0 %v1339_v1  ;;  %v1345_v5 = vld [vmem:[#allocation5 + $0x120] ss:$8 sps:$4 sm:$0xff]   ;;  %v1346_v6 = vld [vmem:[#allocation5 + $0x134] ss:$8 sps:$4 sm:$0xff]   ;;  %v1348_v7 = vld [vmem:[#allocation5 + $0x130] ss:$8 sps:$4 sm:$0xff]  }
  0x3d   :  { %811 = vmatprep.subr.bf16.mxu0 %v1340_v2  ;;  %v1349_v8 = vld [vmem:[#allocation5 + $0x144] ss:$8 sps:$4 sm:$0xff]   ;;  %v1351_v9 = vld [vmem:[#allocation5 + $0x140] ss:$8 sps:$4 sm:$0xff]   ;;  %v1352_v10 = vld [vmem:[#allocation5 + $0x154] ss:$8 sps:$4 sm:$0xff]  }
  0x3e   :  { %v1619_v11 = vmov 1983009808   ;;  %v1354_v14 = vld [vmem:[#allocation5 + $0x150] ss:$8 sps:$4 sm:$0xff]   ;;  %v1379_v15 = vld [vmem:[#allocation5 + $0x4] ss:$8 sps:$4 sm:$0xff]  }
  0x3f   :  { %v84_v12 = vunpack.c.l.s4 %v1619_v11  ;;  %v1381_v16 = vld [vmem:[#allocation5] ss:$8 sps:$4 sm:$0xff]   ;;  %v1355_v17 = vld [vmem:[#allocation5 + $0x164] ss:$8 sps:$4 sm:$0xff]   ;;  %v1691_v19 = vshrl.u32 %v86_v13, 7  ;;  %768 = vmatprep.subr.bf16.mxu1 %v1379_v15  ;;  %vm764_vm0 = vcmask 130048  }
  0x40   :  { %812 = vmatpush1.bf16.msra.mxu0 %v1342_v3  ;;  %769 = vmatpush1.bf16.msra.mxu1 %v1381_v16  ;;  %v1385_v20 = vld [vmem:[#allocation5 + $0x14] ss:$8 sps:$4 sm:$0xff]   ;;  %v1387_v21 = vld [vmem:[#allocation5 + $0x10] ss:$8 sps:$4 sm:$0xff]   ;;  %v1357_v22 = vld [vmem:[#allocation5 + $0x160] ss:$8 sps:$4 sm:$0xff]  }
  0x41   :  { %813 = vmatprep.subr.bf16.mxu0 %v1343_v4  ;;  %v85_v18 = vunpack.c.0.s8 %v84_v12  ;;  %v1358_v23 = vld [vmem:[#allocation5 + $0x174] ss:$8 sps:$4 sm:$0xff]   ;;  %770 = vmatprep.subr.bf16.mxu1 %v1385_v20  ;;  %v1391_v24 = vld [vmem:[#allocation5 + $0x24] ss:$8 sps:$4 sm:$0xff]   ;;  %v1360_v26 = vld [vmem:[#allocation5 + $0x170] ss:$8 sps:$4 sm:$0xff]  }
  0x42   :  { %v1393_v27 = vld [vmem:[#allocation5 + $0x20] ss:$8 sps:$4 sm:$0xff]   ;;  %v1394_v28 = vld [vmem:[#allocation2 + $0x4] ss:$14 sps:$4 sm:$0xff]  }
  0x43   :  { %v1694_v25 = vsub.s32 %v85_v18, %v1691_v19  ;;  %v1396_v29 = vld [vmem:[#allocation2 + $0x20] ss:$14 sps:$4 sm:$0xff]   ;;  %v1361_v30 = vld [vmem:[#allocation5 + $0x184] ss:$8 sps:$4 sm:$0xff]  }
  0x44   :  { %814 = vmatpush1.bf16.msra.mxu0 %v1345_v5  ;;  %771 = vmatpush1.bf16.msra.mxu1 %v1387_v21  ;;  %v1401_v33 = vld [vmem:[#allocation5 + $0x34] ss:$8 sps:$4 sm:$0xff]   ;;  %v1403_v34 = vld [vmem:[#allocation5 + $0x30] ss:$8 sps:$4 sm:$0xff]   ;;  %v1363_v35 = vld [vmem:[#allocation5 + $0x180] ss:$8 sps:$4 sm:$0xff]  }
  0x45   :  { %815 = vmatprep.subr.bf16.mxu0 %v1346_v6  ;;  %772 = vmatprep.subr.bf16.mxu1 %v1391_v24  ;;  %v1697_v31 = vrot.slane %v1394_v28, %v1694_v25  ;;  %v110_v32 = vrot.slane %v1396_v29, %v1694_v25  ;;  %v1364_v37 = vld [vmem:[#allocation5 + $0x194] ss:$8 sps:$4 sm:$0xff]   ;;  %v1407_v38 = vld [vmem:[#allocation5 + $0x44] ss:$8 sps:$4 sm:$0xff]   ;;  %v1366_v39 = vld [vmem:[#allocation5 + $0x190] ss:$8 sps:$4 sm:$0xff]  }
  0x46   :  { %v1409_v41 = vld [vmem:[#allocation5 + $0x40] ss:$8 sps:$4 sm:$0xff]   ;;  %v1413_v42 = vld [vmem:[#allocation5 + $0x54] ss:$8 sps:$4 sm:$0xff]   ;;  %v1367_v43 = vld [vmem:[#allocation5 + $0x1a4] ss:$8 sps:$4 sm:$0xff]  }
  0x47   :  { %v114_v36 = vcombine.high %v1697_v31, %v110_v32  ;;  %v1369_v44 = vld [vmem:[#allocation5 + $0x1a0] ss:$8 sps:$4 sm:$0xff]   ;;  %v1415_v45 = vld [vmem:[#allocation5 + $0x50] ss:$8 sps:$4 sm:$0xff]   ;;  %v1419_v46 = vld [vmem:[#allocation5 + $0x64] ss:$8 sps:$4 sm:$0xff]   ;;  %v113_v1 = vcombine.low %v1697_v31, %v110_v32 }
  0x48   :  { %816 = vmatpush1.bf16.msra.mxu0 %v1348_v7  ;;  %773 = vmatpush1.bf16.msra.mxu1 %v1393_v27  ;;  %v1370_v47 = vld [vmem:[#allocation5 + $0x1b4] ss:$8 sps:$4 sm:$0xff]   ;;  %v1372_v48 = vld [vmem:[#allocation5 + $0x1b0] ss:$8 sps:$4 sm:$0xff]   ;;  %v1421_v49 = vld [vmem:[#allocation5 + $0x60] ss:$8 sps:$4 sm:$0xff]  }
  0x49   :  { %817 = vmatprep.subr.bf16.mxu0 %v1349_v8  ;;  %774 = vmatprep.subr.bf16.mxu1 %v1401_v33  ;;  %v160_v40 = vpack.c.bf16 %v114_v36, %v114_v36  ;;  %v1425_v50 = vld [vmem:[#allocation5 + $0x74] ss:$8 sps:$4 sm:$0xff]   ;;  %v1373_v51 = vld [vmem:[#allocation5 + $0x1c4] ss:$8 sps:$4 sm:$0xff]   ;;  %v1375_v52 = vld [vmem:[#allocation5 + $0x1c0] ss:$8 sps:$4 sm:$0xff]   ;;  %v159_v6 = vpack.c.bf16 %v113_v1, %v113_v1 }
  0x4a   :  { %v1427_v53 = vld [vmem:[#allocation5 + $0x70] ss:$8 sps:$4 sm:$0xff]   ;;  %v1431_v54 = vld [vmem:[#allocation5 + $0x84] ss:$8 sps:$4 sm:$0xff]   ;;  %v1376_v55 = vld [vmem:[#allocation5 + $0x1d4] ss:$8 sps:$4 sm:$0xff]  }
  0x4b   :  { %841 = vmatprep.mubr.bf16.mxu0 %v160_v40  ;;  %v1378_v56 = vld [vmem:[#allocation5 + $0x1d0] ss:$8 sps:$4 sm:$0xff]   ;;  %v1433_v57 = vld [vmem:[#allocation5 + $0x80] ss:$8 sps:$4 sm:$0xff]   ;;  %v1437_v58 = vld [vmem:[#allocation5 + $0x94] ss:$8 sps:$4 sm:$0xff]  }
  0x4c   :  { %818 = vmatpush1.bf16.msra.mxu0 %v1351_v9  ;;  %775 = vmatpush1.bf16.msra.mxu1 %v1403_v34  ;;  %v1382_v59 = vld [vmem:[#allocation5 + $0x1e4] ss:$8 sps:$4 sm:$0xff]   ;;  %v1384_v60 = vld [vmem:[#allocation5 + $0x1e0] ss:$8 sps:$4 sm:$0xff]   ;;  %v1439_v61 = vld [vmem:[#allocation5 + $0x90] ss:$8 sps:$4 sm:$0xff]  }
  0x4d   :  { %819 = vmatprep.subr.bf16.mxu0 %v1352_v10  ;;  %776 = vmatprep.subr.bf16.mxu1 %v1407_v38  ;;  %v1443_v62 = vld [vmem:[#allocation5 + $0xa4] ss:$8 sps:$4 sm:$0xff]   ;;  %v1388_v63 = vld [vmem:[#allocation5 + $0x1f4] ss:$8 sps:$4 sm:$0xff]   ;;  %v1390_v0 = vld [vmem:[#allocation5 + $0x1f0] ss:$8 sps:$4 sm:$0xff]  }
  0x4e   :  { %v1445_v2 = vld [vmem:[#allocation5 + $0xa0] ss:$8 sps:$4 sm:$0xff]   ;;  %v1449_v3 = vld [vmem:[#allocation5 + $0xb4] ss:$8 sps:$4 sm:$0xff]   ;;  %v1400_v4 = vld [vmem:[#allocation5 + $0x204] ss:$8 sps:$4 sm:$0xff]  }
  0x4f   :  { %v1398_v5 = vld [vmem:[#allocation5 + $0x200] ss:$8 sps:$4 sm:$0xff]   ;;  %v1451_v7 = vld [vmem:[#allocation5 + $0xb0] ss:$8 sps:$4 sm:$0xff]   ;;  %v1455_v8 = vld [vmem:[#allocation5 + $0xc4] ss:$8 sps:$4 sm:$0xff]  }
  0x50   :  { %820 = vmatpush1.bf16.msra.mxu0 %v1354_v14  ;;  %777 = vmatpush1.bf16.msra.mxu1 %v1409_v41  ;;  %v1479_v9 = vld [vmem:[#allocation2] ss:$14 sps:$4 sm:$0xff]   ;;  %v1480_v10 = vld [vmem:[#allocation2 + $0x1c] ss:$14 sps:$4 sm:$0xff]  }
  0x51   :  { %821 = vmatprep.subr.bf16.mxu0 %v1355_v17  ;;  %778 = vmatprep.subr.bf16.mxu1 %v1413_v42  ;;  %v1406_v11 = vld [vmem:[#allocation5 + $0x214] ss:$8 sps:$4 sm:$0xff]   ;;  %v89_v12 = vrot.slane %v1479_v9, %v1694_v25  ;;  %v103_v13 = vrot.slane %v1480_v10, %v1694_v25  ;;  %v1404_v14 = vld [vmem:[#allocation5 + $0x210] ss:$8 sps:$4 sm:$0xff]   ;;  %v1457_v15 = vld [vmem:[#allocation5 + $0xc0] ss:$8 sps:$4 sm:$0xff]  }
  0x52   :  { %v1412_v16 = vld [vmem:[#allocation5 + $0x224] ss:$8 sps:$4 sm:$0xff]   ;;  %v1461_v17 = vld [vmem:[#allocation5 + $0xd4] ss:$8 sps:$4 sm:$0xff]   ;;  %v1463_v24 = vld [vmem:[#allocation5 + $0xd0] ss:$8 sps:$4 sm:$0xff]  }
  0x53   :  { %v112_v18 = vcombine.high %v89_v12, %v103_v13  ;;  %v1490_v21 = vld [vmem:[#allocation2 + $0x8] ss:$14 sps:$4 sm:$0xff]   ;;  %v1424_v32 = vld [vmem:[#allocation5 + $0x244] ss:$8 sps:$4 sm:$0xff]   ;;  %v111_v40 = vcombine.low %v89_v12, %v103_v13 }
  0x54   :  { %822 = vmatpush1.bf16.msra.mxu0 %v1357_v22  ;;  %779 = vmatpush1.bf16.msra.mxu1 %v1415_v45  ;;  %v1493_v22 = vld [vmem:[#allocation2 + $0x24] ss:$14 sps:$4 sm:$0xff]   ;;  %v1705_v27 = vrot.slane %v1490_v21, %v1694_v25  ;;  %v1469_v33 = vld [vmem:[#allocation5 + $0xe0] ss:$8 sps:$4 sm:$0xff]  }
  0x55   :  { %823 = vmatprep.subr.bf16.mxu0 %v1358_v23  ;;  %780 = vmatprep.subr.bf16.mxu1 %v1419_v46  ;;  %v158_v20 = vpack.c.bf16 %v112_v18, %v112_v18  ;;  %v1410_v23 = vld [vmem:[#allocation5 + $0x220] ss:$8 sps:$4 sm:$0xff]   ;;  %v1708_v28 = vrot.slane %v1493_v22, %v1694_v25  ;;  %v1418_v29 = vld [vmem:[#allocation5 + $0x234] ss:$8 sps:$4 sm:$0xff]   ;;  %v1475_v38 = vld [vmem:[#allocation5 + $0xf0] ss:$8 sps:$4 sm:$0xff]   ;;  %v157_v45 = vpack.c.bf16 %v111_v40, %v111_v40 }
  0x56   :  { %v1473_v34 = vld [vmem:[#allocation5 + $0xf4] ss:$8 sps:$4 sm:$0xff]   ;;  %v1486_v41 = vld [vmem:[#allocation5 + $0x304] ss:$8 sps:$4 sm:$0xff]   ;;  %v1458_v1 = vld [vmem:[#allocation5 + $0x2a0] ss:$8 sps:$4 sm:$0xff]  }
  0x57   :  { %800 = vmatprep.mubr.bf16.mxu1 %v158_v20  ;;  %v148_v31 = vcombine.high %v1705_v27, %v1708_v28  ;;  %v1495_v36 = vld [vmem:[#allocation2 + $0x28] ss:$14 sps:$4 sm:$0x33]   ;;  %v1481_v9 = vld [vmem:[#allocation5 + $0x2e0] ss:$8 sps:$4 sm:$0xff]  }
  0x58   :  { %824 = vmatpush1.bf16.msra.mxu0 %v1360_v26  ;;  %781 = vmatpush1.bf16.msra.mxu1 %v1421_v49  ;;  %v1467_v26 = vld [vmem:[#allocation5 + $0xe4] ss:$8 sps:$4 sm:$0xff]   ;;  %v1430_v42 = vld [vmem:[#allocation5 + $0x254] ss:$8 sps:$4 sm:$0xff]   ;;  %v1487_v12 = vld [vmem:[#allocation5 + $0x2f0] ss:$8 sps:$4 sm:$0xff]  }
  0x59   :  { %825 = vmatprep.subr.bf16.mxu0 %v1361_v30  ;;  %782 = vmatprep.subr.bf16.mxu1 %v1425_v50  ;;  %v1416_v30 = vld [vmem:[#allocation5 + $0x230] ss:$8 sps:$4 sm:$0xff]   ;;  %v1436_v49 = vld [vmem:[#allocation5 + $0x264] ss:$8 sps:$4 sm:$0xff]   ;;  %v1489_v10 = vld [vmem:[#allocation5 + $0x2f4] ss:$8 sps:$4 sm:$0xff]  }
  0x5a   :  { %v1506_v18 = vld [vmem:[#allocation7 + $0x68] sm:$0xff]   ;;  %v1508_v21 = vld [vmem:[#allocation7 + $0x70] sm:$0xff]  }
  0x5b   :  { %v1507_v20 = vld [vmem:[#allocation7 + $0x28] sm:$0xff]   ;;  %v1509_v22 = vld [vmem:[#allocation7 + $0x30] sm:$0xff]  }
  0x5c   :  { %826 = vmatpush1.bf16.msra.mxu0 %v1363_v35  ;;  %783 = vmatpush1.bf16.msra.mxu1 %v1427_v53  ;;  %v1492_v35 = vld [vmem:[#allocation2 + $0xc] ss:$14 sps:$4 sm:$0x33]  }
  0x5d   :  { %827 = vmatprep.subr.bf16.mxu0 %v1364_v37  ;;  %784 = vmatprep.subr.bf16.mxu1 %v1431_v54  ;;  %v162_v37 = vpack.c.bf16 %v148_v31, %v148_v31  ;;  %v132_v46 = vrot.slane %v1492_v35, %v1694_v25  ;;  %v1442_v53 = vld [vmem:[#allocation5 + $0x274] ss:$8 sps:$4 sm:$0xff]   ;;  %v262_v35 = vld [vmem:[%s1739_s2] sm:$0x3] }
  0x60   :  { %828 = vmatpush1.bf16.msra.mxu0 %v1366_v39  ;;  %785 = vmatpush1.bf16.msra.mxu1 %v1433_v57  ;;  %v1422_v39 = vld [vmem:[#allocation5 + $0x240] ss:$8 sps:$4 sm:$0xff]   ;;  %v1448_v57 = vld [vmem:[#allocation5 + $0x284] ss:$8 sps:$4 sm:$0xff]  }
  0x61   :  { %829 = vmatprep.subr.bf16.mxu0 %v1367_v43  ;;  %786 = vmatprep.subr.bf16.mxu1 %v1437_v58  ;;  %v1484_v43 = vld [vmem:[#allocation5 + $0x300] ss:$8 sps:$4 sm:$0xff]   ;;  %v1499_v58 = vld [vmem:[#allocation7 + $0x8] sm:$0xff]  }
  0x64   :  { %830 = vmatpush1.bf16.msra.mxu0 %v1369_v44  ;;  %787 = vmatpush1.bf16.msra.mxu1 %v1439_v61  ;;  %v1428_v44 = vld [vmem:[#allocation5 + $0x250] ss:$8 sps:$4 sm:$0xff]   ;;  %v1454_v61 = vld [vmem:[#allocation5 + $0x294] ss:$8 sps:$4 sm:$0xff]  }
  0x65   :  { %831 = vmatprep.subr.bf16.mxu0 %v1370_v47  ;;  %788 = vmatprep.subr.bf16.mxu1 %v1443_v62  ;;  %v146_v47 = vrot.slane %v1495_v36, %v1694_v25  ;;  %v1440_v25 = vld [vmem:[#allocation5 + $0x270] ss:$8 sps:$4 sm:$0xff]   ;;  %v1501_v62 = vld [vmem:[#allocation7 + $0x10] sm:$0xff]   ;;  %v270_v36 = vsub.s32 1, %v1691_v19 }
  0x67   :  { %v149_v50 = vcombine.low %v132_v46, %v146_v47 }
  0x68   :  { %832 = vmatpush1.bf16.msra.mxu0 %v1372_v48  ;;  %789 = vmatpush1.bf16.msra.mxu1 %v1445_v2  ;;  %v1496_v48 = vld [vmem:[#allocation7 + $0x40] sm:$0xff]  }
  0x69   :  { %833 = vmatprep.subr.bf16.mxu0 %v1373_v51  ;;  %790 = vmatprep.subr.bf16.mxu1 %v1449_v3  ;;  %v1620_v51 = vmov 0   ;;  %v163_v54 = vpack.c.bf16 %v149_v50, %v149_v50  ;;  %v1466_v2 = vld [vmem:[#allocation5 + $0x2b4] ss:$8 sps:$4 sm:$0xff]   ;;  %v1464_v3 = vld [vmem:[#allocation5 + $0x2b0] ss:$8 sps:$4 sm:$0xff]  }
  0x6c   :  { %834 = vmatpush1.bf16.msra.mxu0 %v1375_v52  ;;  %791 = vmatpush1.bf16.msra.mxu1 %v1451_v7  ;;  %v1434_v52 = vld [vmem:[#allocation5 + $0x260] ss:$8 sps:$4 sm:$0xff]   ;;  %v1476_v7 = vld [vmem:[#allocation5 + $0x2d0] ss:$8 sps:$4 sm:$0xff]  }
  0x6d   :  { %835 = vmatprep.subr.bf16.mxu0 %v1376_v55  ;;  %792 = vmatprep.subr.bf16.mxu1 %v1455_v8  ;;  %v1497_v55 = vld [vmem:[#allocation7] sm:$0xff]   ;;  %v1483_v8 = vld [vmem:[#allocation5 + $0x2e4] ss:$8 sps:$4 sm:$0xff]  }
  0x70   :  { %836 = vmatpush1.bf16.msra.mxu0 %v1378_v56  ;;  %793 = vmatpush1.bf16.msra.mxu1 %v1457_v15  ;;  %v1498_v56 = vld [vmem:[#allocation7 + $0x48] sm:$0xff]   ;;  %v1503_v15 = vld [vmem:[#allocation7 + $0x18] sm:$0xff]  }
  0x71   :  { %837 = vmatprep.subr.bf16.mxu0 %v1382_v59  ;;  %794 = vmatprep.subr.bf16.mxu1 %v1461_v17  ;;  %v1446_v59 = vld [vmem:[#allocation5 + $0x280] ss:$8 sps:$4 sm:$0xff]   ;;  %v1505_v17 = vld [vmem:[#allocation7 + $0x20] sm:$0xff]  }
  0x74   :  { %838 = vmatpush1.bf16.msra.mxu0 %v1384_v60  ;;  %795 = vmatpush1.bf16.msra.mxu1 %v1463_v24  ;;  %v1500_v60 = vld [vmem:[#allocation7 + $0x50] sm:$0xff]   ;;  %v1511_v24 = vld [vmem:[#allocation7 + $0x38] sm:$0xff]  }
  0x75   :  { %839 = vmatprep.subr.bf16.mxu0 %v1388_v63  ;;  %796 = vmatprep.subr.bf16.mxu1 %v1467_v26  ;;  %v1452_v63 = vld [vmem:[#allocation5 + $0x290] ss:$8 sps:$4 sm:$0xff]  }
  0x78   :  { %840 = vmatpush1.bf16.msra.mxu0 %v1390_v0  ;;  %797 = vmatpush1.bf16.msra.mxu1 %v1469_v33  ;;  %v1460_v0 = vld [vmem:[#allocation5 + $0x2a4] ss:$8 sps:$4 sm:$0xff]  }
  0x79   :  { %850 = vmatprep.subr.bf16.mxu0 %v1400_v4  ;;  %798 = vmatprep.subr.bf16.mxu1 %v1473_v34  ;;  %v1472_v4 = vld [vmem:[#allocation5 + $0x2c4] ss:$8 sps:$4 sm:$0xff]   ;;  %v266_v34 = vsub.s32 0, %v1691_v19 }
  0x7b   :  { %842 = vmatmul.mubr.bf16.vlgmr.msra.gmra.mrb[0].mxu0 %v159_v6  ;;  %v1478_v6 = vld [vmem:[#allocation5 + $0x2d4] ss:$8 sps:$4 sm:$0xff]  }
  0x7c   :  { %851 = vmatpush1.bf16.msra.mxu0 %v1398_v5  ;;  %882 = vmatprep.mubr.bf16.mxu0 %v162_v37  ;;  %v1470_v5 = vld [vmem:[#allocation5 + $0x2c0] ss:$8 sps:$4 sm:$0xff]   ;;  %v267_v37 = vrot.slane %v262_v35, %v266_v34 }
  0x7d   :  { %852 = vmatprep.subr.bf16.mxu0 %v1406_v11  ;;  %799 = vmatpush1.bf16.msra.mxu1 %v1475_v38  ;;  %v147_v11 = vcombine.low %v1705_v27, %v1708_v28  ;;  %v271_v38 = vrot.slane %v262_v35, %v270_v36 }
  0x7e   :  { %891 = vmatprep.subr.bf16.mxu1 %v1486_v41 }
  0x7f   :  { %v161_v13 = vpack.c.bf16 %v147_v11, %v147_v11 }
  0x80   :  { %853 = vmatpush1.bf16.msra.mxu0 %v1404_v14  ;;  %801 = vmatmul.mubr.bf16.vlgmr.msra.gmra.mrb[0].mxu1 %v157_v45  ;;  %v1502_v14 = vld [vmem:[#allocation7 + $0x58] sm:$0xff]  }
  0x81   :  { %854 = vmatprep.subr.bf16.mxu0 %v1412_v16  ;;  %892 = vmatpush1.bf16.msra.mxu1 %v1484_v43  ;;  %v1504_v16 = vld [vmem:[#allocation7 + $0x60] sm:$0xff]  }
  0x82   :  { %923 = vmatprep.mubr.bf16.mxu1 %v1620_v51  ;;  %1290 = vmatprep.subr.bf16.mxu1 %v1496_v48 }
  0x84   :  { %855 = vmatpush1.bf16.msra.mxu0 %v1410_v23  ;;  %v1510_v23 = vld [vmem:[#allocation7 + $0x78] sm:$0xff]  }
  0x85   :  { %856 = vmatprep.subr.bf16.mxu0 %v1418_v29 }
  0x88   :  { %857 = vmatpush1.bf16.msra.mxu0 %v1416_v30  ;;  %1270 = vmatmul.mubr.msk.bf16.vlgmr.msra.gmra.mrb[4].mxu1 %vm764_vm0, %v163_v54 }
  0x89   :  { %858 = vmatprep.subr.bf16.mxu0 %v1424_v32  ;;  %1291 = vmatpush3.bf16.msra.mxu1 %v1497_v55  ;;  %v1271_v55 = vld [vmem:[%s1741_s4] ss:$0 sm:$0xff] }
  0x8a   :  { %1292 = vmatprep.subr.bf16.mxu1 %v1498_v56 }
  0x8c   :  { %859 = vmatpush1.bf16.msra.mxu0 %v1422_v39 }
  0x8d   :  { %860 = vmatprep.subr.bf16.mxu0 %v1430_v42  ;;  %1293 = vmatpush3.bf16.msra.mxu1 %v1499_v58 }
  0x8e   :  { %1294 = vmatprep.subr.bf16.mxu1 %v1500_v60 }
  0x90   :  { %861 = vmatpush1.bf16.msra.mxu0 %v1428_v44 }
  0x91   :  { %862 = vmatprep.subr.bf16.mxu0 %v1436_v49  ;;  %1295 = vmatpush3.bf16.msra.mxu1 %v1501_v62 }
  0x92   :  { %1296 = vmatprep.subr.bf16.mxu1 %v1502_v14 }
  0x94   :  { %863 = vmatpush1.bf16.msra.mxu0 %v1434_v52 }
  0x95   :  { %864 = vmatprep.subr.bf16.mxu0 %v1442_v53  ;;  %1297 = vmatpush3.bf16.msra.mxu1 %v1503_v15 }
  0x96   :  { %1298 = vmatprep.subr.bf16.mxu1 %v1504_v16 }
  0x98   :  { %865 = vmatpush1.bf16.msra.mxu0 %v1440_v25 }
  0x99   :  { %866 = vmatprep.subr.bf16.mxu0 %v1448_v57  ;;  %1299 = vmatpush3.bf16.msra.mxu1 %v1505_v17 }
  0x9a   :  { %1300 = vmatprep.subr.bf16.mxu1 %v1506_v18 }
  0x9c   :  { %867 = vmatpush1.bf16.msra.mxu0 %v1446_v59 }
  0x9d   :  { %868 = vmatprep.subr.bf16.mxu0 %v1454_v61  ;;  %1301 = vmatpush3.bf16.msra.mxu1 %v1507_v20 }
  0x9e   :  { %1302 = vmatprep.subr.bf16.mxu1 %v1508_v21 }
  0xa0   :  { %869 = vmatpush1.bf16.msra.mxu0 %v1452_v63 }
  0xa1   :  { %870 = vmatprep.subr.bf16.mxu0 %v1460_v0  ;;  %1303 = vmatpush3.bf16.msra.mxu1 %v1509_v22  ;;  %v1621_v0 = vmov 1966171168  }
  0xa2   :  { %1304 = vmatprep.subr.bf16.mxu1 %v1510_v23 }
  0xa4   :  { %871 = vmatpush1.bf16.msra.mxu0 %v1458_v1  ;;  %v1123_v1 = vunpack.c.l.s4 %v1621_v0 }
  0xa5   :  { %872 = vmatprep.subr.bf16.mxu0 %v1466_v2  ;;  %1305 = vmatpush3.bf16.msra.mxu1 %v1511_v24 }
  0xa6   :  { %v1124_v2 = vunpack.c.0.s8 %v1123_v1 }
  0xa8   :  { %873 = vmatpush1.bf16.msra.mxu0 %v1464_v3 }
  0xa9   :  { %874 = vmatprep.subr.bf16.mxu0 %v1472_v4  ;;  %v1127_v4 = vsub.s32 %v1124_v2, %v1691_v19 }
  0xac   :  { %875 = vmatpush1.bf16.msra.mxu0 %v1470_v5 }
  0xad   :  { %876 = vmatprep.subr.bf16.mxu0 %v1478_v6 }
  0xb0   :  { %877 = vmatpush1.bf16.msra.mxu0 %v1476_v7 }
  0xb1   :  { %878 = vmatprep.subr.bf16.mxu0 %v1483_v8 }
  0xb4   :  { %879 = vmatpush1.bf16.msra.mxu0 %v1481_v9 }
  0xb5   :  { %880 = vmatprep.subr.bf16.mxu0 %v1489_v10 }
  0xb8   :  { %881 = vmatpush1.bf16.msra.mxu0 %v1487_v12 }
  0xbb   :  { %883 = vmatmul.mubr.bf16.vlgmr.msra.gmra.mrb[0].mxu0 %v161_v13 }
 0x153   :  { %v802_v26 = vpop.f32.mrb[0].mxu1 }
 0x154   :  { %v804_v27 = vpop.f32.mrb[1].mxu1  ;;  %v803_v39 = vadd.f32 %v802_v26, %v267_v37 }
 0x155   :  { %v806_v28 = vpop.f32.mrb[2].mxu1  ;;  %v805_v40 = vadd.f32 %v804_v27, %v271_v38 }
 0x156   :  { %v807_v29 = vpop.f32.mrb[3].mxu1 }
 0x15b   :  { %v925_v30 = vpop.f32.mrb[4].mxu1 }
 0x15c   :  { %v927_v31 = vpop.f32.mrb[5].mxu1 }
 0x15d   :  { %v929_v32 = vpop.f32.mrb[6].mxu1 }
 0x15e   :  { %v930_v33 = vpop.f32.mrb[7].mxu1 }
 0x18e   :  { %v884_v41 = vpop.f32.mrb[0].mxu0 }
 0x18f   :  { %v1313_v42 = vadd.f32 %v884_v41, %v803_v39  ;;  %v886_v43 = vpop.f32.mrb[1].mxu0 }
 0x190   :  { %v1316_v44 = vadd.f32 %v886_v43, %v805_v40  ;;  %v888_v45 = vpop.f32.mrb[2].mxu0 }
 0x191   :  { %v1314_v46 = vadd.f32 %v1313_v42, %v925_v30  ;;  %v889_v47 = vpop.f32.mrb[3].mxu0 }
 0x192   :  { %v1317_v48 = vadd.f32 %v1316_v44, %v927_v31 }
 0x193   :  { %v932_v49 = vmax.f32 %v1314_v46, 0.0 }
 0x194   :  { %v933_v50 = vmax.f32 %v1317_v48, 0.0 }
 0x195   :  { %v934_v52 = vpack.c.bf16 %v932_v49, %v932_v49 }
 0x196   :  { %v935_v51 = vpack.c.bf16 %v933_v50, %v933_v50 }
 0x198   :  { %1103 = vmatprep.mubr.bf16.mxu1 %v935_v51 }
 0x199   :  { %1104 = vmatmul.mubr.bf16.vlgmr.msra.gmra.mrb[8].mxu1 %v934_v52 }
 0x26c   :  { %v1306_v53 = vpop.f32.mrb[8].mxu1 }
 0x26d   :  { %v1307_v54 = vpop.f32.mrb[9].mxu1 }
 0x26e   :  { %v1308_v25 = vadd.f32 %v1307_v54, %v1306_v53  ;;  %v1309_v56 = vpop.f32.mrb[10].mxu1 }
 0x26f   :  { %v1310_v57 = vpop.f32.mrb[11].mxu1 }
 0x270   :  { %v1106_v58 = vadd.f32 %v1308_v25, %v1271_v55 }
 0x272   :  { %1111 = vmax.xlane.f32.xlu0 %v1106_v58 }
 0x2ff   :  { %v1112_v59 = vpop.xlane.xlu0 %1111 }
 0x300   :  { %v1113_v60 = vsub.f32 %v1106_v58, %v1112_v59 }
 0x302   :  { %v1114_v61 = vmul.f32 1.442695, %v1113_v60 }
 0x304   :  { %1512 = vpow2.f32 %v1114_v61 }
 0x30e   :  { %v1513_v62 = vpop.eup %1512 }
 0x30f   :  { %1116 = vadd.xlane.f32.xlu0 %v1513_v62 }
 0x39c   :  { %v1117_v63 = vpop.xlane.xlu0 %1116 }
 0x39d   :  { %1514 = vrcp.f32 %v1117_v63 }
 0x3a7   :  { %v1515_v3 = vpop.eup %1514 }
 0x3a8   :  { %v1119_v5 = vmul.f32 %v1515_v3, %v1513_v62 }
 0x3aa   :  { %v1120_v6 = vpack.c.bf16 %v1119_v5, %v1119_v5 }
 0x3ac   :  { %v1128_v7 = vrot.slane %v1120_v6, %v1127_v4 }
 0x3ae   :  { %v1129_v8 = vcombine.high %v1128_v7, %v1128_v7  ;;  %v1136_v9 = vrot.slane %v1128_v7, %v1127_v4  ;;  %1288 = vst.sshfl [vmem:[#allocation8] sm:$0x1 pattern:$0x73625140] %v1128_v7 }
 0x3b0   :  { %v1143_v10 = vrot.slane %v1129_v8, %v1127_v4  ;;  %v1144_v11 = vcombine.high %v1136_v9, %v1136_v9  ;;  %1289 = vst.sshfl [vmem:[#allocation8 + $0x1] sm:$0x1 pattern:$0x73625140] %v1129_v8 }
 0x3b2   :  { %v1145_v12 = vcombine.high %v1143_v10, %v1143_v10  ;;  %1152 = vst [vmem:[#allocation8 + $0x2] sm:$0x1] %v1144_v11 }
 0x3b4   :  { %1153 = vst [vmem:[#allocation8 + $0x3] sm:$0x1] %v1145_v12 }
 0x3b5   :  { %1158 = vsyncadd [#allocation4], 48  ;;  %s1622_s4 = smov [#allocation8]  }
 0x3b6   :  { %s1159_s11 = sshll.u32 %s1622_s4, 4  ;;  %s1160_s11 = int_to_ptr.vmem [resolvable:$true] %s1159_s11 }
 0x3b7   :  { %s1582_s12 = scalar_lea.vmem %s1160_s11, 16  ;;  %s1586_s13 = scalar_lea.vmem %s1160_s11, 64 }
 0x3b8   :  { %p1583_p10 = scmp.ne.s32.totalorder %s1160_s11, %s1582_s12  ;;  %p1587_p11 = scmp.lt.s32.totalorder %s1160_s11, %s1160_s11 }
 0x3b9   :  { %p1588_p12 = scmp.lt.s32.totalorder %s1586_s13, %s1582_s12 }
 0x3bb   :  { %p1589_p13 = por %p1588_p12, %p1587_p11 }
 0x3bd   :  { %p1590_p0 = pnand %p1589_p13, %p1583_p10 }
 0x3bf   :  { %1593 = shalt.err (!%p1590_p0)
}
 0x3c0   :  { %s1594_s16 = scalar_lea.hbm %s1742_s5, 16 }
 0x3c1   :  { %p1595_p1 = scmp.ne.s32.totalorder %s1742_s5, %s1594_s16  ;;  %p1598_p2 = scmp.lt.u32.totalorder %s1594_s16, %s1742_s5 }
 0x3c3   :  { %p1600_p3 = pnand %p1598_p2, %p1595_p1 }
 0x3c5   :  { %1603 = shalt.err (!%p1600_p3)
}
 0x3c6   :  { %s1623_s20 = smov 16   ;;  %s1624_s21 = smov 1  }
 0x3c7   :  { %1165 = dma.vmem_to_hbm [thread:$0]  %s1160_s11, 16, %s1742_s5, [#allocation4], %s1623_s20, %s1623_s20, %s1624_s21  }
 0x3c8   :  { %1608 = dma.done.wait [#allocation4], 64  }
 0x3c9   :  { %1609 = vsyncadd [#allocation4], 4294967232 }
 0x3ca   :  { %1169 = vsyncpa [#allocation3], 1 }
 0x3cb   :  { %1170 = vsyncpa [#allocation6], 1 }
 0x3cc   :  { %1171 = vsyncpa [#allocation4], 1 }

</bundles_post_ra>
